<compile_context>
chip_gen: v5e
topology: v5e:2x2
jax: 0.10.0
libtpu: 0.0.40
codegen_flags: <defaults>
</compile_context>

<pallas_src>
import functools

import jax
import jax.numpy as jnp
from jax.experimental import pallas as pl
from jax.experimental.pallas import tpu as pltpu


def _round_up(v, m):
    return ((v + m - 1) // m) * m


def _actor_kernel(n_layers, k_pad, x_ref, w_ref, b_ref, out_ref):
    """Fused Actor MLP forward.

    x_ref  : (B, k_pad)               f32  feature-padded input
    w_ref  : (n_layers, k_pad, n_pad) f32  zero-padded weight slab, (in, out) layout
    b_ref  : (n_layers, n_pad)        f32  zero-padded bias slab
    out_ref: (B, n_pad)               f32  softmax(dim=0) of final logits; padded
                                           action columns hold a harmless uniform 1/B
    """
    h = x_ref[...]  # (B, k_pad) — already f32, no cast needed

    # Hidden layers: Linear + ReLU.  n_layers / k_pad are static Python ints, so
    # the loop is unrolled and all slab indexing below is static (zero-cost views).
    for l in range(n_layers - 1):
        z = jnp.dot(h, w_ref[l], preferred_element_type=jnp.float32)
        z = z + b_ref[l:l + 1, :]
        # Zero padding in W/b keeps the extra lanes exactly 0 through ReLU, so
        # slicing back to k_pad input lanes for the next layer is exact.
        h = jnp.maximum(z, 0.0)[:, :k_pad]

    # Final Linear -> logits (B, n_pad); padded columns are all-zero.
    lf = n_layers - 1
    logits = jnp.dot(h, w_ref[lf], preferred_element_type=jnp.float32)
    logits = logits + b_ref[lf:lf + 1, :]

    # Softmax over dim=0 (batch axis), matching F.softmax(..., dim=0).
    m = jnp.max(logits, axis=0, keepdims=True)
    e = jnp.exp(logits - m)
    denom = jnp.sum(e, axis=0, keepdims=True)
    # Exact reciprocal (approx=False) keeps 1e-5 parity with the reference while
    # pushing the divide off the VALU.
    out_ref[...] = e * pl.reciprocal(denom)


def actor_forward(x, params):
    """x: (batch, state_space) f32. params: list of (W, b) with W (in, out)."""
    n_layers = len(params)
    batch, state_space = x.shape
    action_space = params[-1][0].shape[1]

    in_feats = [w.shape[0] for w, _ in params]
    out_feats = [w.shape[1] for w, _ in params]
    k_pad = _round_up(max(in_feats), 8)                     # sublane-aligned contraction dim
    n_pad = _round_up(max(max(out_feats), k_pad), 128)      # lane-dense output dim
    assert k_pad <= n_pad

    # Pack all weights / biases into two zero-padded slabs -> 3 input DMAs total
    # instead of 2*n_layers + 1 tiny padded-tile DMAs.
    w_slab = jnp.zeros((n_layers, k_pad, n_pad), jnp.float32)
    b_slab = jnp.zeros((n_layers, n_pad), jnp.float32)
    for l, (w, b) in enumerate(params):
        w_slab = w_slab.at[l, :w.shape[0], :w.shape[1]].set(w.astype(jnp.float32))
        b_slab = b_slab.at[l, :w.shape[1]].set(jnp.reshape(b, (-1,)).astype(jnp.float32))

    x_pad = jnp.zeros((batch, k_pad), jnp.float32).at[:, :state_space].set(
        x.astype(jnp.float32))

    kernel = functools.partial(_actor_kernel, n_layers, k_pad)

    # Small problem: one grid point, every operand fully resident in VMEM.
    # TODO(synk): when evaluating many independent state batches, stack them on a
    # leading grid axis (one forward per grid step) to amortize launch overhead.
    out_padded = pl.pallas_call(
        kernel,
        out_shape=jax.ShapeDtypeStruct((batch, n_pad), jnp.float32),
        in_specs=[pl.BlockSpec(memory_space=pltpu.MemorySpace.VMEM)] * 3,
        out_specs=pl.BlockSpec(memory_space=pltpu.MemorySpace.VMEM),
    )(x_pad, w_slab, b_slab)

    # Padded action columns contain a uniform softmax of zeros; drop them here so
    # the kernel's store stays lane-dense / unmasked.
    return out_padded[:, :action_space]


def init_actor_params(key, state_space, action_space, num_hidden_layer=2, hidden_dim=None):
    """Deterministic init mimicking nn.Linear's U(-1/sqrt(fan_in), 1/sqrt(fan_in)).

    Layer stack matches the PyTorch Actor: Linear(state, hidden),
    num_hidden_layer x Linear(hidden, hidden), Linear(hidden, action)
    -> num_hidden_layer + 2 Linear layers total.
    """
    if hidden_dim is None:
        hidden_dim = state_space * 2
    dims = [state_space] + [hidden_dim] * (num_hidden_layer + 1) + [action_space]
    params = []
    for i in range(len(dims) - 1):
        fan_in, fan_out = dims[i], dims[i + 1]
        key, kw, kb = jax.random.split(key, 3)
        bound = 1.0 / (fan_in ** 0.5)
        w = jax.random.uniform(kw, (fan_in, fan_out), jnp.float32, -bound, bound)
        b = jax.random.uniform(kb, (1, fan_out), jnp.float32, -bound, bound)
        params.append((w, b))
    return params


def actor_forward_ref(x, params):
    """Pure-JAX reference for correctness checking."""
    h = x
    for w, b in params[:-1]:
        h = jnp.maximum(h @ w + b, 0.0)
    w, b = params[-1]
    logits = h @ w + b
    return jax.nn.softmax(logits, axis=0)


if __name__ == "__main__":
    key = jax.random.PRNGKey(0)

    batch = 8
    state_space = 4
    action_space = 2
    num_hidden_layer = 2
    hidden_dim = state_space * 2  # module default

    key, kx = jax.random.split(key)
    x = jax.random.normal(kx, (batch, state_space), jnp.float32)

    params = init_actor_params(
        key, state_space, action_space,
        num_hidden_layer=num_hidden_layer, hidden_dim=hidden_dim,
    )

    out = actor_forward(x, params)
    out = jax.block_until_ready(out)

    ref = actor_forward_ref(x, params)
    assert out.shape == (batch, action_space)
    # columns sum to 1 (softmax over dim=0)
    assert jnp.allclose(jnp.sum(out, axis=0), jnp.ones((action_space,)), atol=1e-5)
    assert jnp.allclose(out, ref, atol=1e-5, rtol=1e-5)

    print("KERNEL_OK")
</pallas_src>

<mosaic_0001>
module attributes {stable_mosaic.version = 11 : i64} {
  func.func @_actor_kernel(%arg0: memref<8x8xf32, #tpu.memory_space<vmem>>, %arg1: memref<4x8x128xf32, #tpu.memory_space<vmem>>, %arg2: memref<4x128xf32, #tpu.memory_space<vmem>>, %arg3: memref<8x128xf32, #tpu.memory_space<vmem>>) attributes {dimension_semantics = [], scalar_prefetch = 0 : i64, scratch_operands = 0 : i64, tpu.core_type = #tpu.core_type<tc>} {
    %c0 = arith.constant 0 : index
    %c0_0 = arith.constant 0 : index
    %0 = vector.load %arg0[%c0, %c0_0] : memref<8x8xf32, #tpu.memory_space<vmem>>, vector<8x8xf32>
    %c0_1 = arith.constant 0 : index
    %c0_2 = arith.constant 0 : index
    %c0_3 = arith.constant 0 : index
    %1 = vector.load %arg1[%c0_1, %c0_2, %c0_3] : memref<4x8x128xf32, #tpu.memory_space<vmem>>, vector<1x8x128xf32>
    %2 = vector.shape_cast %1 : vector<1x8x128xf32> to vector<8x128xf32>
    %cst = arith.constant dense<0.000000e+00> : vector<8x128xf32>
    %3 = tpu.matmul %0, %2, %cst {dimension_numbers = #tpu.dot_dimension_numbers<[1], [0], [0], [1], [0, 0, 1, 1], [], []>} : vector<8x8xf32>, vector<8x128xf32>, vector<8x128xf32> -> vector<8x128xf32>
    %c0_4 = arith.constant 0 : index
    %c0_5 = arith.constant 0 : index
    %4 = vector.load %arg2[%c0_4, %c0_5] : memref<4x128xf32, #tpu.memory_space<vmem>>, vector<1x128xf32>
    %5 = vector.broadcast %4 : vector<1x128xf32> to vector<8x128xf32>
    %6 = arith.addf %3, %5 : vector<8x128xf32>
    %cst_6 = arith.constant 0.000000e+00 : f32
    %7 = vector.broadcast %cst_6 : f32 to vector<8x128xf32>
    %8 = arith.maximumf %6, %7 : vector<8x128xf32>
    %9 = vector.extract_strided_slice %8 {offsets = [0, 0], sizes = [8, 8], strides = [1, 1]} : vector<8x128xf32> to vector<8x8xf32>
    %c1 = arith.constant 1 : index
    %c0_7 = arith.constant 0 : index
    %c0_8 = arith.constant 0 : index
    %10 = vector.load %arg1[%c1, %c0_7, %c0_8] : memref<4x8x128xf32, #tpu.memory_space<vmem>>, vector<1x8x128xf32>
    %11 = vector.shape_cast %10 : vector<1x8x128xf32> to vector<8x128xf32>
    %cst_9 = arith.constant dense<0.000000e+00> : vector<8x128xf32>
    %12 = tpu.matmul %9, %11, %cst_9 {dimension_numbers = #tpu.dot_dimension_numbers<[1], [0], [0], [1], [0, 0, 1, 1], [], []>} : vector<8x8xf32>, vector<8x128xf32>, vector<8x128xf32> -> vector<8x128xf32>
    %c1_10 = arith.constant 1 : index
    %c0_11 = arith.constant 0 : index
    %13 = vector.load %arg2[%c1_10, %c0_11] : memref<4x128xf32, #tpu.memory_space<vmem>>, vector<1x128xf32>
    %14 = vector.broadcast %13 : vector<1x128xf32> to vector<8x128xf32>
    %15 = arith.addf %12, %14 : vector<8x128xf32>
    %cst_12 = arith.constant 0.000000e+00 : f32
    %16 = vector.broadcast %cst_12 : f32 to vector<8x128xf32>
    %17 = arith.maximumf %15, %16 : vector<8x128xf32>
    %18 = vector.extract_strided_slice %17 {offsets = [0, 0], sizes = [8, 8], strides = [1, 1]} : vector<8x128xf32> to vector<8x8xf32>
    %c2 = arith.constant 2 : index
    %c0_13 = arith.constant 0 : index
    %c0_14 = arith.constant 0 : index
    %19 = vector.load %arg1[%c2, %c0_13, %c0_14] : memref<4x8x128xf32, #tpu.memory_space<vmem>>, vector<1x8x128xf32>
    %20 = vector.shape_cast %19 : vector<1x8x128xf32> to vector<8x128xf32>
    %cst_15 = arith.constant dense<0.000000e+00> : vector<8x128xf32>
    %21 = tpu.matmul %18, %20, %cst_15 {dimension_numbers = #tpu.dot_dimension_numbers<[1], [0], [0], [1], [0, 0, 1, 1], [], []>} : vector<8x8xf32>, vector<8x128xf32>, vector<8x128xf32> -> vector<8x128xf32>
    %c2_16 = arith.constant 2 : index
    %c0_17 = arith.constant 0 : index
    %22 = vector.load %arg2[%c2_16, %c0_17] : memref<4x128xf32, #tpu.memory_space<vmem>>, vector<1x128xf32>
    %23 = vector.broadcast %22 : vector<1x128xf32> to vector<8x128xf32>
    %24 = arith.addf %21, %23 : vector<8x128xf32>
    %cst_18 = arith.constant 0.000000e+00 : f32
    %25 = vector.broadcast %cst_18 : f32 to vector<8x128xf32>
    %26 = arith.maximumf %24, %25 : vector<8x128xf32>
    %27 = vector.extract_strided_slice %26 {offsets = [0, 0], sizes = [8, 8], strides = [1, 1]} : vector<8x128xf32> to vector<8x8xf32>
    %c3 = arith.constant 3 : index
    %c0_19 = arith.constant 0 : index
    %c0_20 = arith.constant 0 : index
    %28 = vector.load %arg1[%c3, %c0_19, %c0_20] : memref<4x8x128xf32, #tpu.memory_space<vmem>>, vector<1x8x128xf32>
    %29 = vector.shape_cast %28 : vector<1x8x128xf32> to vector<8x128xf32>
    %cst_21 = arith.constant dense<0.000000e+00> : vector<8x128xf32>
    %30 = tpu.matmul %27, %29, %cst_21 {dimension_numbers = #tpu.dot_dimension_numbers<[1], [0], [0], [1], [0, 0, 1, 1], [], []>} : vector<8x8xf32>, vector<8x128xf32>, vector<8x128xf32> -> vector<8x128xf32>
    %c3_22 = arith.constant 3 : index
    %c0_23 = arith.constant 0 : index
    %31 = vector.load %arg2[%c3_22, %c0_23] : memref<4x128xf32, #tpu.memory_space<vmem>>, vector<1x128xf32>
    %32 = vector.broadcast %31 : vector<1x128xf32> to vector<8x128xf32>
    %33 = arith.addf %30, %32 : vector<8x128xf32>
    %cst_24 = arith.constant dense<0xFF800000> : vector<128xf32>
    %34 = vector.multi_reduction <maximumf>, %33, %cst_24 [0] : vector<8x128xf32> to vector<128xf32>
    %35 = vector.shape_cast %34 : vector<128xf32> to vector<1x128xf32>
    %36 = vector.broadcast %35 : vector<1x128xf32> to vector<8x128xf32>
    %37 = arith.subf %33, %36 : vector<8x128xf32>
    %38 = math.exp %37 : vector<8x128xf32>
    %cst_25 = arith.constant dense<0.000000e+00> : vector<128xf32>
    %39 = vector.multi_reduction <add>, %38, %cst_25 [0] : vector<8x128xf32> to vector<128xf32>
    %40 = vector.shape_cast %39 : vector<128xf32> to vector<1x128xf32>
    %41 = tpu.reciprocal %40 : vector<1x128xf32> -> vector<1x128xf32>
    %42 = vector.broadcast %41 : vector<1x128xf32> to vector<8x128xf32>
    %43 = arith.mulf %38, %42 : vector<8x128xf32>
    %c0_26 = arith.constant 0 : index
    %c0_27 = arith.constant 0 : index
    %44 = vector.load %arg3[%c0_26, %c0_27] : memref<8x128xf32, #tpu.memory_space<vmem>>, vector<8x128xf32>
    tpu.vector_store %arg3[%c0_26, %c0_27], %43 {strides = array<i32>} : memref<8x128xf32, #tpu.memory_space<vmem>>, vector<8x128xf32>,
    return
  }
}

</mosaic_0001>

<bundles_post_ra>
// kernel: tpu_custom_call.1
= control target key start
LH: loop header
LB: loop body
LE: loop exit
PB: predicated region body
PF: predicated region fallthrough
CT: control target
= control target key end

     0   :  { %8 = vsyncpa [#allocation3], 0  ;;  %s381_s0 = inlined_call_operand.hbm [shape: f32[8,8], index: 0, kind: input, shape index: {}]   ;;  %s382_s1 = inlined_call_operand.hbm [shape: f32[4,8,128], index: 1, kind: input, shape index: {}]   ;;  %s383_s2 = inlined_call_operand.hbm [shape: f32[4,128], index: 2, kind: input, shape index: {}]   ;;  %s384_s3 = inlined_call_operand.hbm [shape: f32[8,128], index: 3, kind: output, shape index: {}]  }
   0x1   :  { %9 = vsyncpa [#allocation6], 0  ;;  %s26_s14 = sshll.u32 %s382_s1, 4  ;;  %s27_s14 = int_to_ptr.hbm [resolvable:$true] %s26_s14 }
   0x2   :  { %10 = vsyncpa [#allocation4], 0  ;;  %s339_s15 = smov [#allocation5]   ;;  %s16_s19 = sshll.u32 %s381_s0, 4  ;;  %s17_s19 = int_to_ptr.hbm [resolvable:$true] %s16_s19 }
   0x3   :  { %s28_s16 = sshll.u32 %s339_s15, 4  ;;  %s340_s20 = smov 128   ;;  %s29_s16 = int_to_ptr.vmem [resolvable:$true] %s28_s16 }
   0x4   :  { %s341_s21 = smov 8   ;;  %s342_s22 = smov [#allocation2]  }
   0x5   :  { %34 = dma.hbm_to_vmem [thread:$0]  %s27_s14, 512, %s29_s16, [#allocation6], %s340_s20, %s340_s20, %s341_s21  }
   0x6   :  { %s18_s23 = sshll.u32 %s342_s22, 4  ;;  %s40_s26 = sshll.u32 %s383_s2, 4  ;;  %s19_s23 = int_to_ptr.vmem [resolvable:$true] %s18_s23  ;;  %s41_s26 = int_to_ptr.hbm [resolvable:$true] %s40_s26 }
   0x7   :  { %21 = dma.hbm_to_vmem [thread:$0]  %s17_s19, 128, %s19_s23, [#allocation3]  }
   0x8   :  { %s343_s1 = smov [#allocation7]  }
   0x9   :  { %s42_s27 = sshll.u32 %s343_s1, 4  ;;  %s43_s27 = int_to_ptr.vmem [resolvable:$true] %s42_s27 }
   0xa   :  { %45 = dma.hbm_to_vmem [thread:$0]  %s41_s26, 64, %s43_s27, [#allocation6]  }
   0xb   :  { %333 = dma.done.wait [#allocation3], 128  }
   0xc   :  { %334 = vsyncadd [#allocation3], 4294967168 }
   0xd   :  { %335 = dma.done.wait [#allocation6], 576  }
   0xe   :  { %336 = vsyncadd [#allocation6], 4294966720  ;;  %vm62_vm0 = vcmask 64512   ;;  %v59_v0 = vld [vmem:[#allocation5] sm:$0xff]  ;;  %v58_v1 = vld [vmem:[#allocation2] sm:$0xff]  ;;  %s344_s0 = smov [#allocation8]  }
   0xf   :  { %81 = vmatpush.msra.mxu0 %v59_v0  ;;  %v88_v2 = vld [vmem:[#allocation5 + $0x8] sm:$0xff]  ;;  %v229_v3 = vld [vmem:[#allocation7] ss:$0 sm:$0xff]  ;;  %v116_v7 = vld [vmem:[#allocation5 + $0x10] sm:$0xff]  ;;  %s206_s2 = sshll.u32 %s344_s0, 4  ;;  %s208_s30 = sshll.u32 %s384_s3, 4  ;;  %s207_s2 = int_to_ptr.vmem [resolvable:$true] %s206_s2  ;;  %s209_s30 = int_to_ptr.hbm [resolvable:$true] %s208_s30 }
  0x10   :  { %219 = vmatmul.msk.f32.vlgmr.msra.gmra.mxu0 %vm62_vm0, %v58_v1  ;;  %109 = vmatpush.msra.mxu1 %v88_v2  ;;  %v230_v8 = vld [vmem:[#allocation7 + $0x1] ss:$0 sm:$0xff]  ;;  %v144_v12 = vld [vmem:[#allocation5 + $0x18] sm:$0xff]  ;;  %v231_v13 = vld [vmem:[#allocation7 + $0x2] ss:$0 sm:$0xff] }
  0x11   :  { %137 = vmatpush.msra.mxu2 %v116_v7  ;;  %165 = vmatpush.msra.mxu3 %v144_v12  ;;  %v232_v17 = vld [vmem:[#allocation7 + $0x3] ss:$0 sm:$0xff] }
  0x8d   :  { %v83_v4 = vpop.f32.mrf.mxu0 }
  0x8e   :  { %v84_v5 = vadd.f32 %v229_v3, %v83_v4 }
  0x90   :  { %v86_v6 = vmax.f32 %v84_v5, 0.0 }
  0x92   :  { %220 = vmatmul.msk.f32.vlgmr.msra.gmra.mxu1 %vm62_vm0, %v86_v6 }
 0x10f   :  { %v111_v9 = vpop.f32.mrf.mxu1 }
 0x110   :  { %v112_v10 = vadd.f32 %v230_v8, %v111_v9 }
 0x112   :  { %v114_v11 = vmax.f32 %v112_v10, 0.0 }
 0x114   :  { %221 = vmatmul.msk.f32.vlgmr.msra.gmra.mxu2 %vm62_vm0, %v114_v11 }
 0x197   :  { %v139_v14 = vpop.f32.mrf.mxu2 }
 0x198   :  { %v140_v15 = vadd.f32 %v231_v13, %v139_v14 }
 0x19a   :  { %v142_v16 = vmax.f32 %v140_v15, 0.0 }
 0x19c   :  { %222 = vmatmul.msk.f32.vlgmr.msra.gmra.mxu3 %vm62_vm0, %v142_v16 }
 0x21f   :  { %v167_v18 = vpop.f32.mrf.mxu3 }
 0x220   :  { %v168_v19 = vadd.f32 %v232_v17, %v167_v18 }
 0x222   :  { %v170_v20 = vrot.slane %v168_v19, 4 }
 0x224   :  { %v171_v21 = vmax.f32 %v168_v19, %v170_v20 }
 0x226   :  { %v172_v22 = vrot.slane %v171_v21, 2 }
 0x228   :  { %v173_v23 = vmax.f32 %v171_v21, %v172_v22 }
 0x22a   :  { %v174_v24 = vrot.slane %v173_v23, 1 }
 0x22c   :  { %v175_v25 = vmax.f32 %v173_v23, %v174_v24 }
 0x22e   :  { %v176_v26 = vsub.f32 %v168_v19, %v175_v25 }
 0x230   :  { %v177_v27 = vmul.f32 1.442695, %v176_v26 }
 0x232   :  { %233 = vpow2.f32 %v177_v27 }
 0x238   :  { %v234_v28 = vpop.eup %233 }
 0x239   :  { %v179_v29 = vrot.slane %v234_v28, 4 }
 0x23b   :  { %v180_v30 = vadd.f32 %v234_v28, %v179_v29 }
 0x23d   :  { %v181_v31 = vrot.slane %v180_v30, 2 }
 0x23f   :  { %v182_v32 = vadd.f32 %v181_v31, %v180_v30 }
 0x241   :  { %v183_v33 = vrot.slane %v182_v32, 1 }
 0x243   :  { %v184_v34 = vadd.f32 %v183_v33, %v182_v32 }
 0x245   :  { %235 = vrcp.f32 %v184_v34  ;;  %v196_v38 = vand.u32 2147483648, %v184_v34  ;;  %v194_v40 = vand.u32 2147483647, %v184_v34  ;;  %vm190_vm2 = vweird.f32 %v184_v34 }
 0x247   :  { %v197_v42 = vor.u32 1.1754944e-38, %v196_v38  ;;  %vm195_vm4 = vcmp.eq.f32.partialorder %v194_v40, 8.507059e+37 }
 0x24b   :  { %v236_v35 = vpop.eup %235 }
 0x24c   :  { %v186_v36 = vmul.f32 %v236_v35, %v184_v34  ;;  %vm191_vm1 = vweird.f32 %v236_v35 }
 0x24d   :  { %vm192_vm3 = vmor %vm190_vm2, %vm191_vm1 }
 0x24e   :  { %v187_v37 = vsub.f32 1.0, %v186_v36 }
 0x250   :  { %v188_v39 = vmul.f32 %v236_v35, %v187_v37 }
 0x252   :  { %v189_v41 = vadd.f32 %v236_v35, %v188_v39 }
 0x254   :  { %v193_v43 = vsel %vm192_vm3, %v236_v35, %v189_v41 }
 0x255   :  { %v198_v44 = vsel %vm195_vm4, %v197_v42, %v193_v43 }
 0x256   :  { %v199_v45 = vmul.f32 %v234_v28, %v198_v44 }
 0x258   :  { %200 = vst [vmem:[#allocation8] sm:$0xff] %v199_v45 }
 0x259   :  { %211 = dma.vmem_to_hbm [thread:$0]  %s207_s2, 128, %s209_s30, [#allocation4]  }
 0x25a   :  { %337 = dma.done.wait [#allocation4], 128  }
 0x25b   :  { %338 = vsyncadd [#allocation4], 4294967168 }
 0x25c   :  { %216 = vsyncpa [#allocation3], 1 }
 0x25d   :  { %217 = vsyncpa [#allocation6], 1 }
 0x25e   :  { %218 = vsyncpa [#allocation4], 1 }

</bundles_post_ra>
